<compile_context>
chip_gen: v5e
topology: v5e:2x2
jax: 0.10.0
libtpu: 0.0.40
codegen_flags: <defaults>
</compile_context>

<pallas_src>
import math

import jax
import jax.numpy as jnp
from jax.experimental import pallas as pl
from jax.experimental.pallas import tpu as pltpu

NEG_SLOPE = 0.001  # LeakyReLU negative slope used by the PyTorch module


def _leaky_relu(x):
    return jnp.where(x >= 0, x, NEG_SLOPE * x)


def _mlp_kernel(x_ref, w1_ref, b1_ref, w2_ref, b2_ref, w3_ref, b3_ref,
                w4_ref, b4_ref, out_ref):
    # Activations are (features, TB): batch on lanes (lane-dense), features on
    # sublanes.  Matmuls: bf16 x bf16 -> f32 on the MXU.  Bias (out, 1)
    # broadcasts along lanes; elementwise path stays in f32.
    x = x_ref[...]                                            # (in, TB) bf16

    h = jnp.dot(w1_ref[...], x, preferred_element_type=jnp.float32)
    h = _leaky_relu(h + b1_ref[...])                          # (hid, TB) f32

    h = jnp.dot(w2_ref[...], h.astype(jnp.bfloat16),
                preferred_element_type=jnp.float32)
    h = _leaky_relu(h + b2_ref[...])

    h = jnp.dot(w3_ref[...], h.astype(jnp.bfloat16),
                preferred_element_type=jnp.float32)
    h = _leaky_relu(h + b3_ref[...])

    y = jnp.dot(w4_ref[...], h.astype(jnp.bfloat16),
                preferred_element_type=jnp.float32) + b4_ref[...]

    out_ref[...] = y.astype(out_ref.dtype)                    # (out, TB) f32


def meta_value_network(x, params, *, tile_b=None):
    """Forward pass of MetaValueNetwork via one batch-tiled Pallas kernel.

    x:      (B, input_size) float32  (PyTorch layout)
    params: dict with PyTorch-oriented weights w1..w4 of shape (out, in) and
            biases b1..b4 of shape (out, 1), all float32.
    returns (B, output_size) float32
    """
    B, in_size = x.shape
    hid = params["w1"].shape[0]
    out_size = params["w4"].shape[0]

    # Batch tile: lane-dense (multiple of 128).  These shapes are tiny, so the
    # same tile comfortably fits v7x's 64 MiB VMEM as well as v5e/v6e's 128 MiB.
    if tile_b is None:
        tile_b = 512 if B >= 512 else 128
    n_tiles = pl.cdiv(B, tile_b)
    b_pad = n_tiles * tile_b

    # Flip layout: batch on the last (lane) axis; pad batch to the tile.
    xt = jnp.transpose(x)                                     # (in, B)
    if b_pad != B:
        xt = jnp.pad(xt, ((0, 0), (0, b_pad - B)))
    xt = xt.astype(jnp.bfloat16)

    ws = [params[f"w{i}"].astype(jnp.bfloat16) for i in range(1, 5)]
    bs = [params[f"b{i}"].astype(jnp.float32) for i in range(1, 5)]

    def act_spec(rows):
        return pl.BlockSpec((rows, tile_b), lambda i: (0, i))

    def const_spec(shape):
        return pl.BlockSpec(shape, lambda i: (0, 0))

    out_t = pl.pallas_call(
        _mlp_kernel,
        out_shape=jax.ShapeDtypeStruct((out_size, b_pad), jnp.float32),
        grid=(n_tiles,),
        in_specs=[
            act_spec(in_size),
            const_spec(ws[0].shape), const_spec(bs[0].shape),
            const_spec(ws[1].shape), const_spec(bs[1].shape),
            const_spec(ws[2].shape), const_spec(bs[2].shape),
            const_spec(ws[3].shape), const_spec(bs[3].shape),
        ],
        out_specs=act_spec(out_size),
        compiler_params=pltpu.CompilerParams(
            dimension_semantics=("parallel",),
            vmem_limit_bytes=32 * 1024 * 1024,
        ),
    )(xt, ws[0], bs[0], ws[1], bs[1], ws[2], bs[2], ws[3], bs[3])

    return jnp.transpose(out_t)[:B]                           # (B, out)


def init_params(key, input_size, hidden_size, output_size):
    """Deterministic init mimicking nn.Linear's uniform(-1/sqrt(in), 1/sqrt(in)).

    Weights kept in PyTorch orientation (out_features, in_features); biases (out, 1).
    """
    dims = [(hidden_size, input_size),
            (hidden_size, hidden_size),
            (hidden_size, hidden_size),
            (output_size, hidden_size)]
    params = {}
    for i, (fan_out, fan_in) in enumerate(dims, start=1):
        key, kw, kb = jax.random.split(key, 3)
        bound = 1.0 / math.sqrt(float(fan_in))
        params[f"w{i}"] = jax.random.uniform(
            kw, (fan_out, fan_in), jnp.float32, -bound, bound)
        params[f"b{i}"] = jax.random.uniform(
            kb, (fan_out, 1), jnp.float32, -bound, bound)
    return params


def reference_forward_f32(x, params):
    """Pure f32 reference matching PyTorch semantics exactly."""
    h = x
    for i in range(1, 4):
        h = h @ params[f"w{i}"].T + params[f"b{i}"].T
        h = jnp.where(h >= 0, h, NEG_SLOPE * h)
    return h @ params["w4"].T + params["b4"].T


def reference_forward_bf16(x, params):
    """Reference with the same bf16-operand / f32-accumulate scheme as the kernel."""
    h = x.astype(jnp.bfloat16)
    for i in range(1, 4):
        w = params[f"w{i}"].astype(jnp.bfloat16)
        h = jnp.dot(h, w.T, preferred_element_type=jnp.float32) + params[f"b{i}"].T
        h = jnp.where(h >= 0, h, NEG_SLOPE * h).astype(jnp.bfloat16)
    w = params["w4"].astype(jnp.bfloat16)
    return jnp.dot(h, w.T, preferred_element_type=jnp.float32) + params["b4"].T


if __name__ == "__main__":
    key = jax.random.PRNGKey(0)
    batch = 256          # >= 128 so the lane-dense (features, B) layout pays off
    input_size = 16
    hidden_size = 32
    output_size = 4

    kx, kp = jax.random.split(key)
    x = jax.random.normal(kx, (batch, input_size), jnp.float32)
    params = init_params(kp, input_size, hidden_size, output_size)

    out = meta_value_network(x, params)
    out = jax.block_until_ready(out)

    assert out.shape == (batch, output_size)

    ref_bf16 = reference_forward_bf16(x, params)
    ref_f32 = reference_forward_f32(x, params)
    # Tight check vs. a reference using the identical bf16/f32-acc scheme.
    assert jnp.allclose(out, ref_bf16, atol=1e-2, rtol=1e-2)
    # Loose sanity check vs. the exact PyTorch-semantics f32 reference.
    assert jnp.allclose(out, ref_f32, atol=1e-1, rtol=1e-1)

    print("KERNEL_OK")
</pallas_src>

<mosaic_0001>
module attributes {stable_mosaic.version = 11 : i64} {
  func.func @_mlp_kernel(%arg0: i32, %arg1: memref<16x128xbf16, #tpu.memory_space<vmem>>, %arg2: memref<32x16xbf16, #tpu.memory_space<vmem>>, %arg3: memref<32x1xf32, #tpu.memory_space<vmem>>, %arg4: memref<32x32xbf16, #tpu.memory_space<vmem>>, %arg5: memref<32x1xf32, #tpu.memory_space<vmem>>, %arg6: memref<32x32xbf16, #tpu.memory_space<vmem>>, %arg7: memref<32x1xf32, #tpu.memory_space<vmem>>, %arg8: memref<4x32xbf16, #tpu.memory_space<vmem>>, %arg9: memref<4x1xf32, #tpu.memory_space<vmem>>, %arg10: memref<4x128xf32, #tpu.memory_space<vmem>>) attributes {dimension_semantics = [#tpu.dimension_semantics<parallel>], iteration_bounds = array<i64: 2>, scalar_prefetch = 0 : i64, scratch_operands = 0 : i64, tpu.core_type = #tpu.core_type<tc>, window_params = [{transform_indices = @transform_0, window_bounds = array<i64: 16, 128>}, {pipeline_mode = #tpu.pipeline_mode<synchronous>, transform_indices = @transform_1, window_bounds = array<i64: 32, 16>}, {pipeline_mode = #tpu.pipeline_mode<synchronous>, transform_indices = @transform_2, window_bounds = array<i64: 32, 1>}, {pipeline_mode = #tpu.pipeline_mode<synchronous>, transform_indices = @transform_3, window_bounds = array<i64: 32, 32>}, {pipeline_mode = #tpu.pipeline_mode<synchronous>, transform_indices = @transform_4, window_bounds = array<i64: 32, 1>}, {pipeline_mode = #tpu.pipeline_mode<synchronous>, transform_indices = @transform_5, window_bounds = array<i64: 32, 32>}, {pipeline_mode = #tpu.pipeline_mode<synchronous>, transform_indices = @transform_6, window_bounds = array<i64: 32, 1>}, {pipeline_mode = #tpu.pipeline_mode<synchronous>, transform_indices = @transform_7, window_bounds = array<i64: 4, 32>}, {pipeline_mode = #tpu.pipeline_mode<synchronous>, transform_indices = @transform_8, window_bounds = array<i64: 4, 1>}, {transform_indices = @transform_9, window_bounds = array<i64: 4, 128>}]} {
    %c0 = arith.constant 0 : index
    %c0_0 = arith.constant 0 : index
    %0 = vector.load %arg1[%c0, %c0_0] : memref<16x128xbf16, #tpu.memory_space<vmem>>, vector<16x128xbf16>
    %c0_1 = arith.constant 0 : index
    %c0_2 = arith.constant 0 : index
    %1 = vector.load %arg2[%c0_1, %c0_2] : memref<32x16xbf16, #tpu.memory_space<vmem>>, vector<32x16xbf16>
    %cst = arith.constant dense<0.000000e+00> : vector<32x128xf32>
    %2 = tpu.matmul %1, %0, %cst {dimension_numbers = #tpu.dot_dimension_numbers<[1], [0], [0], [1], [0, 0, 1, 1], [], []>} : vector<32x16xbf16>, vector<16x128xbf16>, vector<32x128xf32> -> vector<32x128xf32>
    %c0_3 = arith.constant 0 : index
    %c0_4 = arith.constant 0 : index
    %3 = vector.load %arg3[%c0_3, %c0_4] : memref<32x1xf32, #tpu.memory_space<vmem>>, vector<32x1xf32>
    %4 = vector.broadcast %3 : vector<32x1xf32> to vector<32x128xf32>
    %5 = arith.addf %2, %4 : vector<32x128xf32>
    %cst_5 = arith.constant 0.000000e+00 : f32
    %6 = vector.broadcast %cst_5 : f32 to vector<32x128xf32>
    %7 = arith.cmpf oge, %5, %6 : vector<32x128xf32>
    %cst_6 = arith.constant 1.000000e-03 : f32
    %8 = vector.broadcast %cst_6 : f32 to vector<32x128xf32>
    %9 = arith.mulf %8, %5 : vector<32x128xf32>
    %10 = arith.select %7, %5, %9 : vector<32x128xi1>, vector<32x128xf32>
    %c0_7 = arith.constant 0 : index
    %c0_8 = arith.constant 0 : index
    %11 = vector.load %arg4[%c0_7, %c0_8] : memref<32x32xbf16, #tpu.memory_space<vmem>>, vector<32x32xbf16>
    %12 = arith.truncf %10 : vector<32x128xf32> to vector<32x128xbf16>
    %cst_9 = arith.constant dense<0.000000e+00> : vector<32x128xf32>
    %13 = tpu.matmul %11, %12, %cst_9 {dimension_numbers = #tpu.dot_dimension_numbers<[1], [0], [0], [1], [0, 0, 1, 1], [], []>} : vector<32x32xbf16>, vector<32x128xbf16>, vector<32x128xf32> -> vector<32x128xf32>
    %c0_10 = arith.constant 0 : index
    %c0_11 = arith.constant 0 : index
    %14 = vector.load %arg5[%c0_10, %c0_11] : memref<32x1xf32, #tpu.memory_space<vmem>>, vector<32x1xf32>
    %15 = vector.broadcast %14 : vector<32x1xf32> to vector<32x128xf32>
    %16 = arith.addf %13, %15 : vector<32x128xf32>
    %cst_12 = arith.constant 0.000000e+00 : f32
    %17 = vector.broadcast %cst_12 : f32 to vector<32x128xf32>
    %18 = arith.cmpf oge, %16, %17 : vector<32x128xf32>
    %cst_13 = arith.constant 1.000000e-03 : f32
    %19 = vector.broadcast %cst_13 : f32 to vector<32x128xf32>
    %20 = arith.mulf %19, %16 : vector<32x128xf32>
    %21 = arith.select %18, %16, %20 : vector<32x128xi1>, vector<32x128xf32>
    %c0_14 = arith.constant 0 : index
    %c0_15 = arith.constant 0 : index
    %22 = vector.load %arg6[%c0_14, %c0_15] : memref<32x32xbf16, #tpu.memory_space<vmem>>, vector<32x32xbf16>
    %23 = arith.truncf %21 : vector<32x128xf32> to vector<32x128xbf16>
    %cst_16 = arith.constant dense<0.000000e+00> : vector<32x128xf32>
    %24 = tpu.matmul %22, %23, %cst_16 {dimension_numbers = #tpu.dot_dimension_numbers<[1], [0], [0], [1], [0, 0, 1, 1], [], []>} : vector<32x32xbf16>, vector<32x128xbf16>, vector<32x128xf32> -> vector<32x128xf32>
    %c0_17 = arith.constant 0 : index
    %c0_18 = arith.constant 0 : index
    %25 = vector.load %arg7[%c0_17, %c0_18] : memref<32x1xf32, #tpu.memory_space<vmem>>, vector<32x1xf32>
    %26 = vector.broadcast %25 : vector<32x1xf32> to vector<32x128xf32>
    %27 = arith.addf %24, %26 : vector<32x128xf32>
    %cst_19 = arith.constant 0.000000e+00 : f32
    %28 = vector.broadcast %cst_19 : f32 to vector<32x128xf32>
    %29 = arith.cmpf oge, %27, %28 : vector<32x128xf32>
    %cst_20 = arith.constant 1.000000e-03 : f32
    %30 = vector.broadcast %cst_20 : f32 to vector<32x128xf32>
    %31 = arith.mulf %30, %27 : vector<32x128xf32>
    %32 = arith.select %29, %27, %31 : vector<32x128xi1>, vector<32x128xf32>
    %c0_21 = arith.constant 0 : index
    %c0_22 = arith.constant 0 : index
    %33 = vector.load %arg8[%c0_21, %c0_22] : memref<4x32xbf16, #tpu.memory_space<vmem>>, vector<4x32xbf16>
    %34 = arith.truncf %32 : vector<32x128xf32> to vector<32x128xbf16>
    %cst_23 = arith.constant dense<0.000000e+00> : vector<4x128xf32>
    %35 = tpu.matmul %33, %34, %cst_23 {dimension_numbers = #tpu.dot_dimension_numbers<[1], [0], [0], [1], [0, 0, 1, 1], [], []>} : vector<4x32xbf16>, vector<32x128xbf16>, vector<4x128xf32> -> vector<4x128xf32>
    %c0_24 = arith.constant 0 : index
    %c0_25 = arith.constant 0 : index
    %36 = vector.load %arg9[%c0_24, %c0_25] : memref<4x1xf32, #tpu.memory_space<vmem>>, vector<4x1xf32>
    %37 = vector.broadcast %36 : vector<4x1xf32> to vector<4x128xf32>
    %38 = arith.addf %35, %37 : vector<4x128xf32>
    %c0_26 = arith.constant 0 : index
    %c0_27 = arith.constant 0 : index
    %39 = vector.load %arg10[%c0_26, %c0_27] : memref<4x128xf32, #tpu.memory_space<vmem>>, vector<4x128xf32>
    tpu.vector_store %arg10[%c0_26, %c0_27], %38 {strides = array<i32>} : memref<4x128xf32, #tpu.memory_space<vmem>>, vector<4x128xf32>,
    return
  }
  func.func @transform_0(%arg0: i32) -> (i32, i32) {
    %c0_i32 = arith.constant 0 : i32
    %c0_i32_0 = arith.constant 0 : i32
    return %c0_i32, %arg0 : i32, i32
  }
  func.func @transform_1(%arg0: i32) -> (i32, i32) {
    %c0_i32 = arith.constant 0 : i32
    %c0_i32_0 = arith.constant 0 : i32
    %c0_i32_1 = arith.constant 0 : i32
    return %c0_i32, %c0_i32_0 : i32, i32
  }
  func.func @transform_2(%arg0: i32) -> (i32, i32) {
    %c0_i32 = arith.constant 0 : i32
    %c0_i32_0 = arith.constant 0 : i32
    %c0_i32_1 = arith.constant 0 : i32
    return %c0_i32, %c0_i32_0 : i32, i32
  }
  func.func @transform_3(%arg0: i32) -> (i32, i32) {
    %c0_i32 = arith.constant 0 : i32
    %c0_i32_0 = arith.constant 0 : i32
    %c0_i32_1 = arith.constant 0 : i32
    return %c0_i32, %c0_i32_0 : i32, i32
  }
  func.func @transform_4(%arg0: i32) -> (i32, i32) {
    %c0_i32 = arith.constant 0 : i32
    %c0_i32_0 = arith.constant 0 : i32
    %c0_i32_1 = arith.constant 0 : i32
    return %c0_i32, %c0_i32_0 : i32, i32
  }
  func.func @transform_5(%arg0: i32) -> (i32, i32) {
    %c0_i32 = arith.constant 0 : i32
    %c0_i32_0 = arith.constant 0 : i32
    %c0_i32_1 = arith.constant 0 : i32
    return %c0_i32, %c0_i32_0 : i32, i32
  }
  func.func @transform_6(%arg0: i32) -> (i32, i32) {
    %c0_i32 = arith.constant 0 : i32
    %c0_i32_0 = arith.constant 0 : i32
    %c0_i32_1 = arith.constant 0 : i32
    return %c0_i32, %c0_i32_0 : i32, i32
  }
  func.func @transform_7(%arg0: i32) -> (i32, i32) {
    %c0_i32 = arith.constant 0 : i32
    %c0_i32_0 = arith.constant 0 : i32
    %c0_i32_1 = arith.constant 0 : i32
    return %c0_i32, %c0_i32_0 : i32, i32
  }
  func.func @transform_8(%arg0: i32) -> (i32, i32) {
    %c0_i32 = arith.constant 0 : i32
    %c0_i32_0 = arith.constant 0 : i32
    %c0_i32_1 = arith.constant 0 : i32
    return %c0_i32, %c0_i32_0 : i32, i32
  }
  func.func @transform_9(%arg0: i32) -> (i32, i32) {
    %c0_i32 = arith.constant 0 : i32
    %c0_i32_0 = arith.constant 0 : i32
    return %c0_i32, %arg0 : i32, i32
  }
}

</mosaic_0001>

<bundles_post_ra>
// kernel: tpu_custom_call.1
= control target key start
LH: loop header
LB: loop body
LE: loop exit
PB: predicated region body
PF: predicated region fallthrough
CT: control target
= control target key end

     0   :  { %14 = vsyncpa [#allocation4], 0  ;;  %s1097_s0 = inlined_call_operand.vmem [shape: bf16[16,256], index: 0, kind: input, shape index: {}]   ;;  %s1098_s1 = inlined_call_operand.vmem [shape: bf16[32,16], index: 1, kind: input, shape index: {}]   ;;  %s1099_s2 = inlined_call_operand.vmem [shape: f32[32,1], index: 2, kind: input, shape index: {}]   ;;  %s1100_s3 = inlined_call_operand.vmem [shape: bf16[32,32], index: 3, kind: input, shape index: {}]   ;;  %s1101_s4 = inlined_call_operand.vmem [shape: f32[32,1], index: 4, kind: input, shape index: {}]   ;;  %s1102_s5 = inlined_call_operand.vmem [shape: bf16[32,32], index: 5, kind: input, shape index: {}]   ;;  %s1103_s6 = inlined_call_operand.vmem [shape: f32[32,1], index: 6, kind: input, shape index: {}]   ;;  %s1104_s7 = inlined_call_operand.vmem [shape: bf16[4,32], index: 7, kind: input, shape index: {}]   ;;  %s1105_s8 = inlined_call_operand.vmem [shape: f32[4,1], index: 8, kind: input, shape index: {}]   ;;  %s1106_s9 = inlined_call_operand.hbm [shape: f32[4,256], index: 9, kind: output, shape index: {}]  }
   0x1   :  { %16 = vsyncpa [#allocation4 + $0x1], 0  ;;  %s937_s30 = smov 0   ;;  %s939_s10 = smov 0  }
   0x2   :  { %s941_s11 = smov 0   ;;  %s943_s12 = smov 0  }
   0x3 LB: > { %s724_s13 = sadd.s32 4294967295, %s884_s12   ;;  %s725_s14 = sadd.s32 4294967294, %s884_s12   ;;  %s884_s12 = sphi %s943_s12, %s1112_s12   ;;  %s880_s11 = sphi %s941_s11, %s1111_s11   ;;  %s876_s10 = sphi %s939_s10, %s1110_s10   ;;  %s872_s30 = sphi %s937_s30, %s1109_s30  }
   0x4   : > { %s960_s15 = sadd.s32 1, %s884_s12   ;;  %s29_s16 = sadd.s32 1, %s880_s11 }
   0x5   : > { %s26_s17 = ssub.s32 %s884_s12, %s960_s15  ;;  %p36_p0 = scmp.ne.s32.totalorder %s880_s11, %s876_s10 }
   0x6   : > { %p27_p1 = scmp.eq.s32.totalorder %s26_s17, 0  ;;  %p37_p2 = scmp.eq.s32.totalorder %s884_s12, 0 }
   0x7   : > { %p234_p3 = scmp.eq.s32.totalorder %s724_s13, 1  ;;  %p239_p4 = scmp.ne.s32.totalorder %s876_s10, %s872_s30 }
   0x8   : > { %s973_s18 = scalar_select %p27_p1, %s880_s11, %s29_s16  }
   0x9   : > { %p38_p5 = por %p37_p2, %p36_p0  ;;  %p975_p6 = por %p234_p3, %p36_p0 }
   0xa   : > { %p240_p7 = scmp.eq.s32.totalorder %s725_s14, 1  ;;  %p727_p9 = scmp.ge.s32.totalorder %s884_s12, 2 }
   0xc   : > { %p979_p8 = por %p240_p7, %p239_p4  ;;  %280 = sbr.rel (%p727_p9) target bundleno = 23 (0x17), region = 48 }
  0x11   : > { %283 = sbr.rel (!%p38_p5) target bundleno = 23 (0x17), region = 52  ;;  %s285_s21 = sand.u32 (%p38_p5), 1, %s880_s11  }
  0x12   : > { %s729_s22 = sshll.u32 (%p38_p5), %s884_s12, 2  ;;  %s728_s23 = sshll.u32 (%p38_p5), %s285_s21, 3 }
  0x13   : > { %s289_s26 = scalar_lea.vmem (%p38_p5), %s1097_s0, %s729_s22  ;;  %s287_s27 = scalar_lea.vmem (%p38_p5), [#allocation2], %s728_s23 }
  0x14   : > { %v306_v0 = vld [vmem:[%s289_s26] sm:$0xf] (%p38_p5)  ;;  %v308_v1 = vld [vmem:[%s289_s26 + $0x8] sm:$0xf] (%p38_p5) }
  0x15   : > { %307 = vst [vmem:[%s287_s27] sm:$0xf] (%p38_p5), %v306_v0 }
  0x16   : > { %309 = vst [vmem:[%s287_s27 + $0x4] sm:$0xf] %v308_v1 }
  0x17 PF: > { %p730_p10 = scmp.ge.s32.totalorder %s884_s12, 1  ;;  %p336_p11 = scmp.lt.s32.totalorder %s884_s12, 3 }
  0x19   : > { %p337_p12 = pnand %p730_p10, %p336_p11 }
  0x1a   : > { %s997_s14 = sand.u32 (!%p337_p12), 1, %s876_s10   ;;  %s769_s26 = sshll.u32 (!%p337_p12), %s724_s13, 2 }
  0x1b   : > { %340 = sbr.rel (%p337_p12) target bundleno = 676 (0x2a4), region = 93  ;;  %s731_s16 = sshll.u32 (!%p337_p12), %s997_s14, 3 }
  0x1c   : > { %s345_s22 = scalar_lea.vmem (!%p337_p12), [#allocation2], %s731_s16  ;;  %s732_s27 = sshll.u32 (!%p337_p12), %s997_s14, 2 }
  0x1d   : > { %s655_s16 = scalar_lea.hbm (!%p337_p12), %s1106_s9, %s769_s26  ;;  %s377_s17 = scalar_lea.vmem (!%p337_p12), [#allocation3], %s732_s27 }
  0x1e   : > { %s657_s21 = sshll.u32 (!%p337_p12), %s377_s17, 4  ;;  %s645_s23 = scalar_lea.sflag (!%p337_p12), [#allocation4], %s997_s14  ;;  %s658_s21 = int_to_ptr.vmem [resolvable:$true] %s657_s21 }
  0x1f   : > { %s842_s26 = scalar_lea.hbm (!%p337_p12), %s1106_s9, 8 }
  0x20   : > { %v387_v2 = vld [vmem:[%s1099_s2 + $0x10] sm:$0xff]  ;;  %v886_v3 = vmov 0   ;;  %v385_v4 = vld [vmem:[%s1099_s2] sm:$0xff]  ;;  %vm425_vm0 = vcmask 130048   ;;  %v388_v7 = vld [vmem:[%s1099_s2 + $0x18] sm:$0xff]  ;;  %vm503_vm5 = vcmask 261120  }
  0x21   : > { %819 = vset.pattern.permute.xlu0 %v886_v3  ;;  %820 = vset.pattern.permute.xlu1 %v886_v3  ;;  %v772_v5 = vld [vmem:[%s345_s22] sm:$0xff]  ;;  %v550_v12 = vld [vmem:[%s1103_s6 + $0x18] sm:$0xff]  ;;  %v471_v23 = vld [vmem:[%s1101_s4 + $0x10] sm:$0xff]  ;;  %s659_s22 = sshll.u32 %s655_s16, 4  ;;  %s660_s22 = int_to_ptr.hbm [resolvable:$true] %s659_s22 }
  0x22   : > { %401 = vperm.xlu0 %819, %v387_v2   ;;  %391 = vperm.xlu1 %820, %v385_v4   ;;  %v773_v6 = vld [vmem:[%s1098_s1] sm:$0xff]  ;;  %v386_v8 = vld [vmem:[%s1099_s2 + $0x8] sm:$0xff]  ;;  %v472_v34 = vld [vmem:[%s1101_s4 + $0x18] sm:$0xff]  ;;  %s836_s24 = sshra.s32 %s660_s22, 4  ;;  %s837_s24 = int_to_ptr.hbm [resolvable:$true] %s836_s24 }
  0x23   : > { %821 = vset.pattern.permute.xlu2 %v886_v3  ;;  %439 = vmatpush.bf16.msra.mxu0 %v772_v5  ;;  %v469_v9 = vld [vmem:[%s1101_s4] sm:$0xff]  ;;  %v470_v10 = vld [vmem:[%s1101_s4 + $0x8] sm:$0xff]  ;;  %v549_v40 = vld [vmem:[%s1103_s6 + $0x10] sm:$0xff]  ;;  %s838_s25 = scalar_lea.hbm %s837_s24, 4  ;;  %p843_p2 = scmp.lt.s32.totalorder %s837_s24, %s1106_s9 }
  0x24   : > { %v774_v11 = vld [vmem:[%s1098_s1 + $0x8] sm:$0xff]  ;;  %v547_v13 = vld [vmem:[%s1103_s6] sm:$0xff]  ;;  %485 = vperm.xlu2 %821, %v471_v23   ;;  %p839_p13 = scmp.ne.s32.totalorder %s837_s24, %s838_s25  ;;  %p844_p3 = scmp.lt.s32.totalorder %s842_s26, %s838_s25 }
  0x25   : > { %v621_v14 = vld [vmem:[%s1105_s8] sm:$0xf]  ;;  %v548_v41 = vld [vmem:[%s1103_s6 + $0x8] sm:$0xff] }
  0x26   : > { %745 = vmatmul.msk.bf16.vlgmr.msra.gmra.mxu0 %vm425_vm0, %v773_v6  ;;  %v775_v39 = vld [vmem:[%s1100_s3] sm:$0xff]  ;;  %v776_v42 = vld [vmem:[%s1100_s3 + $0x8] sm:$0xff]  ;;  %p840_p0 = pnand %p839_p13, %p975_p6  ;;  %p845_p4 = por %p844_p3, %p843_p2 }
  0x27   : > { %v777_v1 = vld [vmem:[%s1102_s5] sm:$0xff]  ;;  %v778_v2 = vld [vmem:[%s1102_s5 + $0x8] sm:$0xff] }
  0x28   : > { %p841_p1 = pneg %p840_p0 }
  0x2a   : > { %406 = vperm.xlu0 %819, %v388_v7   ;;  %396 = vperm.xlu1 %820, %v386_v8   ;;  %p846_p5 = pnand %p845_p4, %p841_p1 }
  0x2c   : > { %490 = vperm.xlu2 %821, %v472_v34  }
  0x32   : > { %475 = vperm.xlu0 %819, %v469_v9   ;;  %480 = vperm.xlu1 %820, %v470_v10  }
  0x34   : > { %563 = vperm.xlu2 %821, %v549_v40  }
  0x36   : > { %746 = vmatmul.msk.bf16.gmra.mxu0 %vm425_vm0, %v774_v11 }
  0x3a   : > { %568 = vperm.xlu0 %819, %v550_v12   ;;  %553 = vperm.xlu1 %820, %v547_v13  }
  0x3c   : > { %558 = vperm.xlu2 %821, %v548_v41  }
  0x42   : > { %624 = vperm.xlu0 %819, %v621_v14  }
  0x7e   : > { %v486_v45 = vpop.permute.xlu2 %485 }
  0x86   : > { %v491_v51 = vpop.permute.xlu2 %490 }
  0x8e   : > { %v564_v5 = vpop.permute.xlu2 %563 }
  0x94   : > { %v392_v17 = vpop.permute.xlu1 %391  ;;  %v402_v18 = vpop.permute.xlu0 %401 }
  0x96   : > { %v559_v8 = vpop.permute.xlu2 %558 }
  0x9c   : > { %v397_v21 = vpop.permute.xlu1 %396  ;;  %v407_v24 = vpop.permute.xlu0 %406 }
  0xa3   : > { %v441_v15 = vpop.f32.mrf.mxu0 }
  0xa4   : > { %v442_v26 = vadd.f32 %v441_v15, %v392_v17  ;;  %v481_v48 = vpop.permute.xlu1 %480  ;;  %v476_v49 = vpop.permute.xlu0 %475 }
  0xa6   : > { %v455_v31 = vmul.f32 0.001, %v442_v26  ;;  %vm451_vm4 = vcmp.ge.f32.partialorder %v442_v26, 0.0 }
  0xa8   : > { %v459_v37 = vsel %vm451_vm4, %v442_v26, %v455_v31 }
  0xab   : > { %v443_v16 = vpop.f32.mrf.mxu0 }
  0xac   : > { %v444_v22 = vadd.f32 %v443_v16, %v397_v21  ;;  %v569_v9 = vpop.permute.xlu0 %568  ;;  %v554_v11 = vpop.permute.xlu1 %553 }
  0xae   : > { %v456_v29 = vmul.f32 0.001, %v444_v22  ;;  %vm452_vm3 = vcmp.ge.f32.partialorder %v444_v22, 0.0 }
  0xb0   : > { %v460_v36 = vsel %vm452_vm3, %v444_v22, %v456_v29 }
  0xb1   : > { %v467_v38 = vpack.c.bf16 %v460_v36, %v459_v37 }
  0xb3   : > { %v446_v19 = vpop.f32.mrf.mxu0 }
  0xb4   : > { %v447_v20 = vadd.f32 %v446_v19, %v402_v18  ;;  %v625_v26 = vpop.permute.xlu0 %624 }
  0xb6   : > { %v457_v27 = vmul.f32 0.001, %v447_v20  ;;  %vm453_vm1 = vcmp.ge.f32.partialorder %v447_v20, 0.0 }
  0xb8   : > { %v461_v32 = vsel %vm453_vm1, %v447_v20, %v457_v27 }
  0xbb   : > { %v448_v25 = vpop.f32.mrf.mxu0 }
  0xbc   : > { %v449_v28 = vadd.f32 %v448_v25, %v407_v24  ;;  %v618_v25 = vld [vmem:[%s1104_s7] sm:$0x3] }
  0xbe   : > { %v458_v30 = vmul.f32 0.001, %v449_v28  ;;  %vm454_vm2 = vcmp.ge.f32.partialorder %v449_v28, 0.0 }
  0xc0   : > { %v462_v33 = vsel %vm454_vm2, %v449_v28, %v458_v30 }
  0xc1   : > { %v468_v35 = vpack.c.bf16 %v462_v33, %v461_v32 }
  0xc3   : > { %516 = vmatpush.bf16.msra.mxu1 %v468_v35 }
  0xc7   : > { %517 = vmatpush.bf16.msra.mxu1 %v467_v38 }
  0xca   : > { %755 = vmatmul.msk.bf16.vlgmr.msra.gmra.mxu1 %vm503_vm5, %v775_v39 }
  0xda   : > { %756 = vmatmul.msk.bf16.gmra.mxu1 %vm503_vm5, %v776_v42 }
 0x147   : > { %v519_v43 = vpop.f32.mrf.mxu1 }
 0x148   : > { %v520_v53 = vadd.f32 %v519_v43, %v476_v49 }
 0x14a   : > { %v533_v58 = vmul.f32 0.001, %v520_v53  ;;  %vm529_vm9 = vcmp.ge.f32.partialorder %v520_v53, 0.0 }
 0x14c   : > { %v537_v63 = vsel %vm529_vm9, %v520_v53, %v533_v58 }
 0x14f   : > { %v521_v44 = vpop.f32.mrf.mxu1 }
 0x150   : > { %v522_v50 = vadd.f32 %v521_v44, %v481_v48 }
 0x152   : > { %v534_v56 = vmul.f32 0.001, %v522_v50  ;;  %vm530_vm8 = vcmp.ge.f32.partialorder %v522_v50, 0.0 }
 0x154   : > { %v538_v62 = vsel %vm530_vm8, %v522_v50, %v534_v56 }
 0x155   : > { %v545_v0 = vpack.c.bf16 %v538_v62, %v537_v63 }
 0x157   : > { %v524_v46 = vpop.f32.mrf.mxu1 }
 0x158   : > { %v525_v47 = vadd.f32 %v524_v46, %v486_v45 }
 0x15a   : > { %v535_v54 = vmul.f32 0.001, %v525_v47  ;;  %vm531_vm6 = vcmp.ge.f32.partialorder %v525_v47, 0.0 }
 0x15c   : > { %v539_v59 = vsel %vm531_vm6, %v525_v47, %v535_v54 }
 0x15f   : > { %v526_v52 = vpop.f32.mrf.mxu1 }
 0x160   : > { %v527_v55 = vadd.f32 %v526_v52, %v491_v51 }
 0x162   : > { %v536_v57 = vmul.f32 0.001, %v527_v55  ;;  %vm532_vm7 = vcmp.ge.f32.partialorder %v527_v55, 0.0 }
 0x164   : > { %v540_v60 = vsel %vm532_vm7, %v527_v55, %v536_v57 }
 0x165   : > { %v546_v61 = vpack.c.bf16 %v540_v60, %v539_v59 }
 0x167   : > { %593 = vmatpush.bf16.msra.mxu2 %v546_v61 }
 0x16b   : > { %594 = vmatpush.bf16.msra.mxu2 %v545_v0 }
 0x16e   : > { %765 = vmatmul.msk.bf16.vlgmr.msra.gmra.mxu2 %vm503_vm5, %v777_v1 }
 0x17e   : > { %766 = vmatmul.msk.bf16.gmra.mxu2 %vm503_vm5, %v778_v2 }
 0x1f1   : > { %v596_v3 = vpop.f32.mrf.mxu2 }
 0x1f2   : > { %v597_v13 = vadd.f32 %v596_v3, %v554_v11 }
 0x1f4   : > { %v610_v18 = vmul.f32 0.001, %v597_v13  ;;  %vm606_vm13 = vcmp.ge.f32.partialorder %v597_v13, 0.0 }
 0x1f6   : > { %v614_v23 = vsel %vm606_vm13, %v597_v13, %v610_v18 }
 0x1f9   : > { %v598_v4 = vpop.f32.mrf.mxu2 }
 0x1fa   : > { %v599_v10 = vadd.f32 %v598_v4, %v559_v8 }
 0x1fc   : > { %v611_v16 = vmul.f32 0.001, %v599_v10  ;;  %vm607_vm12 = vcmp.ge.f32.partialorder %v599_v10, 0.0 }
 0x1fe   : > { %v615_v22 = vsel %vm607_vm12, %v599_v10, %v611_v16 }
 0x1ff   : > { %v619_v24 = vpack.c.bf16 %v615_v22, %v614_v23 }
 0x201   : > { %v601_v6 = vpop.f32.mrf.mxu2 }
 0x202   : > { %v602_v7 = vadd.f32 %v601_v6, %v564_v5 }
 0x204   : > { %v612_v14 = vmul.f32 0.001, %v602_v7  ;;  %vm608_vm10 = vcmp.ge.f32.partialorder %v602_v7, 0.0 }
 0x206   : > { %v616_v19 = vsel %vm608_vm10, %v602_v7, %v612_v14 }
 0x209   : > { %v603_v12 = vpop.f32.mrf.mxu2 }
 0x20a   : > { %v604_v15 = vadd.f32 %v603_v12, %v569_v9 }
 0x20c   : > { %v613_v17 = vmul.f32 0.001, %v604_v15  ;;  %vm609_vm11 = vcmp.ge.f32.partialorder %v604_v15, 0.0 }
 0x20e   : > { %v617_v20 = vsel %vm609_vm11, %v604_v15, %v613_v17 }
 0x20f   : > { %v620_v21 = vpack.c.bf16 %v617_v20, %v616_v19 }
 0x211   : > { %636 = vmatpush.bf16.msra.mxu3 %v620_v21 }
 0x215   : > { %637 = vmatpush.bf16.msra.mxu3 %v619_v24 }
 0x218   : > { %767 = vmatmul.msk.bf16.vlgmr.msra.gmra.mxu3 %vm503_vm5, %v618_v25 }
 0x29b   : > { %v639_v27 = vpop.f32.mrf.mxu3 }
 0x29c   : > { %v640_v28 = vadd.f32 %v639_v27, %v625_v26 }
 0x29e   : > { %643 = vst [vmem:[%s377_s17] sm:$0xf] %v640_v28 }
 0x29f   : > { %849 = shalt.err (!%p846_p5)
}
 0x2a0   : > { %779 = dma.vmem_to_hbm [thread:$0]  (%p975_p6), %s658_s21, 64, %s660_s22, %s645_s23  }
 0x2a3   : > { %v641_v29 = vpop.f32.mrf.mxu3 }
 0x2a4 PF: > { %s671_s14 = sand.u32 1, %s872_s30   ;;  %p782_p7 = pnand %p727_p9, %p979_p8 }
 0x2a5   : > { %s672_s16 = scalar_lea.sflag [#allocation4], %s671_s14 }
 0x2a6   : > { %p783_p10 = pneg %p782_p7 }
 0x2a8   : > { %867 = dma.done.wait (%p783_p10), %s672_s16, 64  }
 0x2a9   : > { %869 = vsyncadd (%p783_p10), %s672_s16, 4294967232  ;;  %p19_p11 = scmp.ge.s32.totalorder %s960_s15, 4   ;;  %s1109_s30 = smov %s876_s10 }
 0x2aa   : > { %s1110_s10 = smov %s880_s11  ;;  %s1111_s11 = smov %s973_s18 }
 0x2ab   : > { %s1112_s12 = smov %s960_s15  ;;  %21 = sbr.rel (!%p19_p11) target bundleno = 3 (0x3), region = 137 }
 0x2b0   :  { %678 = vsyncpa [#allocation4], 1 }
 0x2b1   :  { %680 = vsyncpa [#allocation4 + $0x1], 1 }

</bundles_post_ra>
